<compile_context>
chip_gen: v5e
topology: v5e:2x2
jax: 0.10.0
libtpu: 0.0.40
codegen_flags: <defaults>
</compile_context>

<pallas_src>
import functools
import math

import jax
import jax.numpy as jnp
from jax import lax
from jax.experimental import pallas as pl
from jax.experimental.pallas import tpu as pltpu


_LANE = 128
_SUBLANE = 8
# Per-step VMEM soft cap: leave headroom under v7x's 64 MiB physical VMEM
# (v5e / v6e have 128 MiB, so this is conservative there too).
_VMEM_SOFT_CAP = 48 * 1024 * 1024


def _round_up(a: int, b: int) -> int:
    return (a + b - 1) // b * b


def _cdiv(a: int, b: int) -> int:
    return (a + b - 1) // b


def _step_vmem_bytes(tm, fea_dim, mem_pad, io_itemsize, w_itemsize):
    """Rough per-grid-step VMEM footprint in bytes."""
    io = 2 * tm * fea_dim * io_itemsize          # x block (double-buffered)
    io += 2 * tm * fea_dim * io_itemsize         # y block
    io += 2 * tm * mem_pad * io_itemsize         # att block
    w_blk = mem_pad * fea_dim * w_itemsize       # W block, single-buffered
    temps = (4 * tm * mem_pad + 2 * tm * fea_dim) * 4   # f32 intermediates (approx)
    return io + w_blk + temps


def _mem_kernel(x_ref, w_ref, y_ref, att_ref, *,
                shrink_thres, valid_mem, compute_dtype):
    """One grid step handles a (tm, fea_dim) slab of flattened input rows."""
    x = x_ref[...].astype(compute_dtype)          # (tm, fea_dim)
    w = w_ref[...]                                # (mem_pad, fea_dim), pre-cast

    # att_weight = x @ W^T as an NT contraction (no explicit transpose of W);
    # f32 accumulation on the MXU.
    logits = lax.dot_general(
        x, w,
        dimension_numbers=(((1,), (1,)), ((), ())),
        preferred_element_type=jnp.float32,
    )                                             # (tm, mem_pad), f32

    # Mask lane-padding columns (only present when mem_dim % 128 != 0).
    if valid_mem != logits.shape[-1]:
        col = lax.broadcasted_iota(jnp.int32, logits.shape, dimension=1)
        logits = jnp.where(col < valid_mem, logits, -jnp.inf)

    # Softmax over mem_dim (torch dim=1 on the 2-D view), exact f32 math.
    m = jnp.max(logits, axis=-1, keepdims=True)
    e = jnp.exp(logits - m)
    att = e / jnp.sum(e, axis=-1, keepdims=True)

    if shrink_thres > 0.0:
        # hard_shrink_relu: relu(a - lambd) * a / (|a - lambd| + eps).
        # Exact division: the denominator can be ~1e-12 right at the threshold,
        # where an approximate EUP reciprocal diverges from the PyTorch result.
        shifted = att - shrink_thres
        att = jnp.maximum(shifted, 0.0) * att / (jnp.abs(shifted) + 1e-12)
        # F.normalize(p=1, dim=1)
        l1 = jnp.sum(jnp.abs(att), axis=-1, keepdims=True)
        att = att / jnp.maximum(l1, 1e-12)

    # output = att @ W  -> (tm, fea_dim) on the MXU.
    y = jnp.dot(att.astype(compute_dtype), w, preferred_element_type=jnp.float32)

    y_ref[...] = y.astype(y_ref.dtype)
    att_ref[...] = att.astype(att_ref.dtype)


def mem_module_forward(x, weight, shrink_thres=0.0025, *,
                       tile_m=512, compute_dtype=jnp.float32):
    """x: (N, C, H, W); weight: (mem_dim, fea_dim) with fea_dim == H*W."""
    n, c, h, w_sp = x.shape
    mem_dim, fea_dim = weight.shape
    assert fea_dim == h * w_sp, "fea_dim must equal H*W"

    m_rows = n * c
    x2d = x.reshape(m_rows, fea_dim)

    # --- weight preparation (once, outside the kernel) -----------------------
    # Pad the bank rows to a lane multiple so the att output block is
    # lane-dense (unmasked stores) and the MXU does not run ragged columns.
    mem_pad = _round_up(mem_dim, _LANE)
    w_prep = weight
    if mem_pad != mem_dim:
        w_prep = jnp.pad(w_prep, ((0, mem_pad - mem_dim), (0, 0)))
    # Pre-cast W to the matmul operand dtype (halves its DMA / VMEM footprint
    # and removes a per-grid-step cast of the whole bank when bf16 is used).
    if w_prep.dtype != jnp.dtype(compute_dtype):
        w_prep = w_prep.astype(compute_dtype)

    # --- row tiling -----------------------------------------------------------
    io_itemsize = jnp.dtype(x.dtype).itemsize
    w_itemsize = jnp.dtype(w_prep.dtype).itemsize

    tm = min(int(tile_m), _round_up(m_rows, _SUBLANE))
    tm = _round_up(tm, _SUBLANE)
    # Shrink the tile until the per-step footprint fits the VMEM soft cap.
    while tm > _SUBLANE and _step_vmem_bytes(
            tm, fea_dim, mem_pad, io_itemsize, w_itemsize) > _VMEM_SOFT_CAP:
        tm = _round_up(tm // 2, _SUBLANE)
    # Keep >= 2 grid steps when there is enough work so the 'parallel' row
    # axis can shard across v7x's two TensorCores.
    if _cdiv(m_rows, tm) < 2 and m_rows >= 2 * _SUBLANE:
        tm = _round_up(_cdiv(m_rows, 2), _SUBLANE)

    grid = (_cdiv(m_rows, tm),)

    # Explicit VMEM budget with headroom (v5e's default scoped limit is 16 MiB).
    est = _step_vmem_bytes(tm, fea_dim, mem_pad, io_itemsize, w_itemsize)
    vmem_limit = int(min(128 * 1024 * 1024,
                         max(16 * 1024 * 1024, (est * 5) // 4)))
    # TODO(synk): for banks where mem_pad*fea_dim alone exceeds the soft cap
    # (v7x, 64 MiB VMEM), add a second 'arbitrary' grid axis over mem_dim
    # chunks with flash-style online-softmax accumulation.

    kernel = functools.partial(
        _mem_kernel,
        shrink_thres=float(shrink_thres),
        valid_mem=int(mem_dim),
        compute_dtype=jnp.dtype(compute_dtype),
    )

    y2d, att2d = pl.pallas_call(
        kernel,
        out_shape=(
            jax.ShapeDtypeStruct((m_rows, fea_dim), x.dtype),
            jax.ShapeDtypeStruct((m_rows, mem_pad), x.dtype),
        ),
        grid_spec=pltpu.PrefetchScalarGridSpec(
            num_scalar_prefetch=0,
            grid=grid,
            in_specs=[
                # Row-tiled input slab (double-buffered by the pipeline).
                pl.BlockSpec((tm, fea_dim), lambda i: (i, 0)),
                # Memory bank: constant block index -> DMA'd once and kept
                # VMEM-resident; single-buffered to halve its VMEM reservation.
                pl.BlockSpec((mem_pad, fea_dim), lambda i: (0, 0),
                             pipeline_mode=pl.Buffered(1)),
            ],
            out_specs=[
                pl.BlockSpec((tm, fea_dim), lambda i: (i, 0)),
                pl.BlockSpec((tm, mem_pad), lambda i: (i, 0)),
            ],
        ),
        compiler_params=pltpu.CompilerParams(
            # Row axis is embarrassingly parallel -> megacore sharding on v7x.
            dimension_semantics=("parallel",),
            vmem_limit_bytes=vmem_limit,
        ),
    )(x2d, w_prep)

    if mem_pad != mem_dim:
        att2d = att2d[:, :mem_dim]

    return {
        "output": y2d.reshape(n, c, h, w_sp),
        "att": att2d.reshape(n, c, mem_dim),
    }


def _reference(x, weight, shrink_thres=0.0025):
    """Pure-JAX reference mirroring the PyTorch forward."""
    n, c, h, w_sp = x.shape
    x2d = x.reshape(n * c, h * w_sp).astype(jnp.float32)
    logits = x2d @ weight.T
    att = jax.nn.softmax(logits, axis=1)
    if shrink_thres > 0:
        shifted = att - shrink_thres
        att = jnp.maximum(shifted, 0.0) * att / (jnp.abs(shifted) + 1e-12)
        att = att / jnp.maximum(jnp.sum(jnp.abs(att), axis=1, keepdims=True), 1e-12)
    y = att @ weight
    return y.reshape(n, c, h, w_sp), att.reshape(n, c, weight.shape[0])


if __name__ == "__main__":
    # Small shapes consistent with the module: x is NCHW, fea_dim = H*W.
    N, C, H, W = 2, 4, 16, 16
    MEM_DIM = 128
    FEA_DIM = H * W  # 256
    SHRINK = 0.0025

    key = jax.random.PRNGKey(0)
    kx, kw = jax.random.split(key)

    x = jax.random.normal(kx, (N, C, H, W), dtype=jnp.float32)

    # Deterministic init matching reset_parameters(): U(-stdv, stdv), stdv = 1/sqrt(fea_dim)
    stdv = 1.0 / math.sqrt(FEA_DIM)
    weight = jax.random.uniform(
        kw, (MEM_DIM, FEA_DIM), dtype=jnp.float32, minval=-stdv, maxval=stdv
    )

    out = mem_module_forward(x, weight, shrink_thres=SHRINK)
    y = jax.block_until_ready(out["output"])
    att = jax.block_until_ready(out["att"])

    # Check against the pure-JAX reference.  All divisions in the kernel are
    # exact now; the tolerance only has to absorb possible MXU pass-count
    # differences between the Pallas matmul and the XLA reference matmul on
    # real hardware (in interpret mode agreement is ~1e-6).
    y_ref, att_ref = _reference(x, weight, shrink_thres=SHRINK)
    assert y.shape == (N, C, H, W)
    assert att.shape == (N, C, MEM_DIM)
    assert jnp.allclose(y, y_ref, atol=2e-3, rtol=2e-3), \
        float(jnp.max(jnp.abs(y - y_ref)))
    assert jnp.allclose(att, att_ref, atol=2e-3, rtol=2e-3), \
        float(jnp.max(jnp.abs(att - att_ref)))

    print("KERNEL_OK")
</pallas_src>

<mosaic_0001>
module attributes {stable_mosaic.version = 11 : i64} {
  func.func @_mem_kernel(%arg0: i32, %arg1: memref<8x256xf32, #tpu.memory_space<vmem>>, %arg2: memref<128x256xf32, #tpu.memory_space<vmem>>, %arg3: memref<8x256xf32, #tpu.memory_space<vmem>>, %arg4: memref<8x128xf32, #tpu.memory_space<vmem>>) attributes {dimension_semantics = [#tpu.dimension_semantics<parallel>], iteration_bounds = array<i64: 1>, scalar_prefetch = 0 : i64, scratch_operands = 0 : i64, tpu.core_type = #tpu.core_type<tc>, window_params = [{transform_indices = @transform_0, window_bounds = array<i64: 8, 256>}, {pipeline_mode = #tpu.pipeline_mode<synchronous>, transform_indices = @transform_1, window_bounds = array<i64: 128, 256>}, {transform_indices = @transform_2, window_bounds = array<i64: 8, 256>}, {transform_indices = @transform_3, window_bounds = array<i64: 8, 128>}]} {
    %c0 = arith.constant 0 : index
    %c0_0 = arith.constant 0 : index
    %0 = vector.load %arg1[%c0, %c0_0] : memref<8x256xf32, #tpu.memory_space<vmem>>, vector<8x256xf32>
    %c0_1 = arith.constant 0 : index
    %c0_2 = arith.constant 0 : index
    %1 = vector.load %arg2[%c0_1, %c0_2] : memref<128x256xf32, #tpu.memory_space<vmem>>, vector<128x256xf32>
    %cst = arith.constant dense<0.000000e+00> : vector<8x128xf32>
    %2 = tpu.matmul %0, %1, %cst {dimension_numbers = #tpu.dot_dimension_numbers<[1], [1], [0], [0], [0, 0, 1, 0], [], []>} : vector<8x256xf32>, vector<128x256xf32>, vector<8x128xf32> -> vector<8x128xf32>
    %cst_3 = arith.constant dense<0xFF800000> : vector<8xf32>
    %3 = vector.multi_reduction <maximumf>, %2, %cst_3 [1] : vector<8x128xf32> to vector<8xf32>
    %4 = vector.shape_cast %3 : vector<8xf32> to vector<8x1xf32>
    %5 = vector.broadcast %4 : vector<8x1xf32> to vector<8x128xf32>
    %6 = arith.subf %2, %5 : vector<8x128xf32>
    %7 = math.exp %6 : vector<8x128xf32>
    %cst_4 = arith.constant dense<0.000000e+00> : vector<8xf32>
    %8 = vector.multi_reduction <add>, %7, %cst_4 [1] : vector<8x128xf32> to vector<8xf32>
    %9 = vector.shape_cast %8 : vector<8xf32> to vector<8x1xf32>
    %10 = vector.broadcast %9 : vector<8x1xf32> to vector<8x128xf32>
    %11 = arith.divf %7, %10 : vector<8x128xf32>
    %cst_5 = arith.constant 2.500000e-03 : f32
    %12 = vector.broadcast %cst_5 : f32 to vector<8x128xf32>
    %13 = arith.subf %11, %12 : vector<8x128xf32>
    %cst_6 = arith.constant 0.000000e+00 : f32
    %14 = vector.broadcast %cst_6 : f32 to vector<8x128xf32>
    %15 = arith.maximumf %13, %14 : vector<8x128xf32>
    %16 = arith.mulf %15, %11 : vector<8x128xf32>
    %17 = math.absf %13 : vector<8x128xf32>
    %cst_7 = arith.constant 9.99999996E-13 : f32
    %18 = vector.broadcast %cst_7 : f32 to vector<8x128xf32>
    %19 = arith.addf %17, %18 : vector<8x128xf32>
    %20 = arith.divf %16, %19 : vector<8x128xf32>
    %21 = math.absf %20 : vector<8x128xf32>
    %cst_8 = arith.constant dense<0.000000e+00> : vector<8xf32>
    %22 = vector.multi_reduction <add>, %21, %cst_8 [1] : vector<8x128xf32> to vector<8xf32>
    %23 = vector.shape_cast %22 : vector<8xf32> to vector<8x1xf32>
    %cst_9 = arith.constant 9.99999996E-13 : f32
    %24 = vector.broadcast %cst_9 : f32 to vector<8x1xf32>
    %25 = arith.maximumf %23, %24 : vector<8x1xf32>
    %26 = vector.broadcast %25 : vector<8x1xf32> to vector<8x128xf32>
    %27 = arith.divf %20, %26 : vector<8x128xf32>
    %cst_10 = arith.constant dense<0.000000e+00> : vector<8x256xf32>
    %28 = tpu.matmul %27, %1, %cst_10 {dimension_numbers = #tpu.dot_dimension_numbers<[1], [0], [0], [1], [0, 0, 1, 1], [], []>} : vector<8x128xf32>, vector<128x256xf32>, vector<8x256xf32> -> vector<8x256xf32>
    %c0_11 = arith.constant 0 : index
    %c0_12 = arith.constant 0 : index
    %29 = vector.load %arg3[%c0_11, %c0_12] : memref<8x256xf32, #tpu.memory_space<vmem>>, vector<8x256xf32>
    tpu.vector_store %arg3[%c0_11, %c0_12], %28 {strides = array<i32>} : memref<8x256xf32, #tpu.memory_space<vmem>>, vector<8x256xf32>,
    %c0_13 = arith.constant 0 : index
    %c0_14 = arith.constant 0 : index
    %30 = vector.load %arg4[%c0_13, %c0_14] : memref<8x128xf32, #tpu.memory_space<vmem>>, vector<8x128xf32>
    tpu.vector_store %arg4[%c0_13, %c0_14], %27 {strides = array<i32>} : memref<8x128xf32, #tpu.memory_space<vmem>>, vector<8x128xf32>,
    return
  }
  func.func @transform_0(%arg0: i32) -> (i32, i32) {
    %c0_i32 = arith.constant 0 : i32
    %c0_i32_0 = arith.constant 0 : i32
    return %arg0, %c0_i32 : i32, i32
  }
  func.func @transform_1(%arg0: i32) -> (i32, i32) {
    %c0_i32 = arith.constant 0 : i32
    %c0_i32_0 = arith.constant 0 : i32
    %c0_i32_1 = arith.constant 0 : i32
    return %c0_i32, %c0_i32_0 : i32, i32
  }
  func.func @transform_2(%arg0: i32) -> (i32, i32) {
    %c0_i32 = arith.constant 0 : i32
    %c0_i32_0 = arith.constant 0 : i32
    return %arg0, %c0_i32 : i32, i32
  }
  func.func @transform_3(%arg0: i32) -> (i32, i32) {
    %c0_i32 = arith.constant 0 : i32
    %c0_i32_0 = arith.constant 0 : i32
    return %arg0, %c0_i32 : i32, i32
  }
}

</mosaic_0001>

<bundles_post_ra>
// kernel: tpu_custom_call.1
= control target key start
LH: loop header
LB: loop body
LE: loop exit
PB: predicated region body
PF: predicated region fallthrough
CT: control target
= control target key end

     0   :  { %9 = vsyncpa [#allocation3], 0  ;;  %s414_s0 = inlined_call_operand.hbm [shape: f32[8,256], index: 0, kind: input, shape index: {}]   ;;  %s415_s1 = inlined_call_operand.hbm [shape: f32[128,256], index: 1, kind: input, shape index: {}]   ;;  %s416_s2 = inlined_call_operand.hbm [shape: f32[8,256], index: 2, kind: output, shape index: {0}]   ;;  %s417_s3 = inlined_call_operand.hbm [shape: f32[8,128], index: 3, kind: output, shape index: {1}]  }
   0x1   :  { %10 = vsyncpa [#allocation6], 0 }
   0x2   :  { %11 = vsyncpa [#allocation4], 0 }
   0x3   :  { %12 = vsyncpa [#allocation9], 0  ;;  %s18_s14 = sshll.u32 %s414_s0, 4  ;;  %s376_s15 = smov [#allocation2]   ;;  %s19_s14 = int_to_ptr.hbm [resolvable:$true] %s18_s14 }
   0x4   :  { %s20_s16 = sshll.u32 %s376_s15, 4  ;;  %s28_s19 = sshll.u32 %s415_s1, 4  ;;  %s21_s16 = int_to_ptr.vmem [resolvable:$true] %s20_s16  ;;  %s29_s19 = int_to_ptr.hbm [resolvable:$true] %s28_s19 }
   0x5   :  { %23 = dma.hbm_to_vmem [thread:$0]  %s19_s14, 256, %s21_s16, [#allocation3]  }
   0x6   :  { %s377_s20 = smov [#allocation5]   ;;  %s378_s22 = smov 256  }
   0x7   :  { %s30_s21 = sshll.u32 %s377_s20, 4  ;;  %s379_s23 = smov 16   ;;  %s31_s21 = int_to_ptr.vmem [resolvable:$true] %s30_s21 }
   0x8   :  { %36 = dma.hbm_to_vmem [thread:$0]  %s29_s19, 4096, %s31_s21, [#allocation6], %s378_s22, %s378_s22, %s379_s23  }
   0x9   :  { %368 = dma.done.wait [#allocation3], 256  }
   0xa   :  { %369 = vsyncadd [#allocation3], 4294967040 }
   0xb   :  { %370 = dma.done.wait [#allocation6], 4096  }
   0xc   :  { %371 = vsyncadd [#allocation6], 4294963200  ;;  %v77_v0 = vld [vmem:[#allocation5 + $0xf0] sm:$0xff]  ;;  %v78_v1 = vld [vmem:[#allocation5 + $0xf8] sm:$0xff]  ;;  %s380_s0 = smov [#allocation8]   ;;  %s241_s26 = sshll.u32 %s417_s3, 4  ;;  %s242_s26 = int_to_ptr.hbm [resolvable:$true] %s241_s26 }
   0xd   :  { %79 = vmatpush.xpose.msra.mxu0 %v77_v0  ;;  %99 = vmatpush.xpose.msra.mxu1 %v78_v1  ;;  %v75_v2 = vld [vmem:[#allocation5 + $0xe0] sm:$0xff]  ;;  %v76_v3 = vld [vmem:[#allocation5 + $0xe8] sm:$0xff]  ;;  %v73_v4 = vld [vmem:[#allocation5 + $0xd0] sm:$0xff]  ;;  %s239_s1 = sshll.u32 %s380_s0, 4  ;;  %s381_s27 = smov [#allocation7]   ;;  %s240_s1 = int_to_ptr.vmem [resolvable:$true] %s239_s1 }
   0xe   :  { %180 = vmatpush.msra.mxu2 %v77_v0  ;;  %200 = vmatpush.msra.mxu3 %v78_v1  ;;  %v74_v5 = vld [vmem:[#allocation5 + $0xd8] sm:$0xff]  ;;  %v71_v6 = vld [vmem:[#allocation5 + $0xc0] sm:$0xff]  ;;  %v72_v7 = vld [vmem:[#allocation5 + $0xc8] sm:$0xff]  ;;  %s228_s28 = sshll.u32 %s381_s27, 4  ;;  %s230_s4 = sshll.u32 %s416_s2, 4  ;;  %s229_s28 = int_to_ptr.vmem [resolvable:$true] %s228_s28  ;;  %s231_s4 = int_to_ptr.hbm [resolvable:$true] %s230_s4 }
   0xf   :  { %v69_v8 = vld [vmem:[#allocation5 + $0xb0] sm:$0xff]  ;;  %v70_v9 = vld [vmem:[#allocation5 + $0xb8] sm:$0xff]  ;;  %v67_v10 = vld [vmem:[#allocation5 + $0xa0] sm:$0xff] }
  0x10   :  { %181 = vmatpush.msra.mxu2 %v75_v2  ;;  %201 = vmatpush.msra.mxu3 %v76_v3  ;;  %v68_v11 = vld [vmem:[#allocation5 + $0xa8] sm:$0xff]  ;;  %v65_v12 = vld [vmem:[#allocation5 + $0x90] sm:$0xff]  ;;  %v66_v13 = vld [vmem:[#allocation5 + $0x98] sm:$0xff] }
  0x11   :  { %80 = vmatpush.xpose.msra.mxu0 %v75_v2  ;;  %100 = vmatpush.xpose.msra.mxu1 %v76_v3  ;;  %v63_v14 = vld [vmem:[#allocation5 + $0x80] sm:$0xff]  ;;  %v64_v15 = vld [vmem:[#allocation5 + $0x88] sm:$0xff]  ;;  %v61_v16 = vld [vmem:[#allocation5 + $0x70] sm:$0xff] }
  0x12   :  { %182 = vmatpush.msra.mxu2 %v73_v4  ;;  %202 = vmatpush.msra.mxu3 %v74_v5  ;;  %v62_v17 = vld [vmem:[#allocation5 + $0x78] sm:$0xff]  ;;  %v59_v18 = vld [vmem:[#allocation5 + $0x60] sm:$0xff]  ;;  %v60_v19 = vld [vmem:[#allocation5 + $0x68] sm:$0xff] }
  0x13   :  { %v57_v20 = vld [vmem:[#allocation5 + $0x50] sm:$0xff]  ;;  %v58_v21 = vld [vmem:[#allocation5 + $0x58] sm:$0xff]  ;;  %v55_v22 = vld [vmem:[#allocation5 + $0x40] sm:$0xff] }
  0x14   :  { %183 = vmatpush.msra.mxu2 %v71_v6  ;;  %203 = vmatpush.msra.mxu3 %v72_v7  ;;  %v56_v23 = vld [vmem:[#allocation5 + $0x48] sm:$0xff]  ;;  %v53_v24 = vld [vmem:[#allocation5 + $0x30] sm:$0xff]  ;;  %v54_v25 = vld [vmem:[#allocation5 + $0x38] sm:$0xff] }
  0x15   :  { %81 = vmatpush.xpose.msra.mxu0 %v73_v4  ;;  %101 = vmatpush.xpose.msra.mxu1 %v74_v5  ;;  %v51_v26 = vld [vmem:[#allocation5 + $0x20] sm:$0xff]  ;;  %v52_v27 = vld [vmem:[#allocation5 + $0x28] sm:$0xff]  ;;  %v49_v28 = vld [vmem:[#allocation5 + $0x10] sm:$0xff] }
  0x16   :  { %184 = vmatpush.msra.mxu2 %v69_v8  ;;  %204 = vmatpush.msra.mxu3 %v70_v9  ;;  %v50_v29 = vld [vmem:[#allocation5 + $0x18] sm:$0xff]  ;;  %v47_v30 = vld [vmem:[#allocation5] sm:$0xff]  ;;  %v48_v31 = vld [vmem:[#allocation5 + $0x8] sm:$0xff] }
  0x17   :  { %v45_v32 = vld [vmem:[#allocation2] sm:$0xff]  ;;  %v46_v33 = vld [vmem:[#allocation2 + $0x8] sm:$0xff] }
  0x18   :  { %185 = vmatpush.msra.mxu2 %v67_v10  ;;  %205 = vmatpush.msra.mxu3 %v68_v11 }
  0x19   :  { %82 = vmatpush.xpose.msra.mxu0 %v71_v6  ;;  %102 = vmatpush.xpose.msra.mxu1 %v72_v7 }
  0x1a   :  { %186 = vmatpush.msra.mxu2 %v65_v12  ;;  %206 = vmatpush.msra.mxu3 %v66_v13 }
  0x1c   :  { %187 = vmatpush.msra.mxu2 %v63_v14  ;;  %207 = vmatpush.msra.mxu3 %v64_v15 }
  0x1d   :  { %83 = vmatpush.xpose.msra.mxu0 %v69_v8  ;;  %103 = vmatpush.xpose.msra.mxu1 %v70_v9 }
  0x1e   :  { %188 = vmatpush.msra.mxu2 %v61_v16  ;;  %208 = vmatpush.msra.mxu3 %v62_v17 }
  0x20   :  { %189 = vmatpush.msra.mxu2 %v59_v18  ;;  %209 = vmatpush.msra.mxu3 %v60_v19 }
  0x21   :  { %84 = vmatpush.xpose.msra.mxu0 %v67_v10  ;;  %104 = vmatpush.xpose.msra.mxu1 %v68_v11 }
  0x22   :  { %190 = vmatpush.msra.mxu2 %v57_v20  ;;  %210 = vmatpush.msra.mxu3 %v58_v21 }
  0x24   :  { %191 = vmatpush.msra.mxu2 %v55_v22  ;;  %211 = vmatpush.msra.mxu3 %v56_v23 }
  0x25   :  { %85 = vmatpush.xpose.msra.mxu0 %v65_v12  ;;  %105 = vmatpush.xpose.msra.mxu1 %v66_v13 }
  0x26   :  { %192 = vmatpush.msra.mxu2 %v53_v24  ;;  %212 = vmatpush.msra.mxu3 %v54_v25 }
  0x28   :  { %193 = vmatpush.msra.mxu2 %v51_v26  ;;  %213 = vmatpush.msra.mxu3 %v52_v27 }
  0x29   :  { %86 = vmatpush.xpose.msra.mxu0 %v63_v14  ;;  %106 = vmatpush.xpose.msra.mxu1 %v64_v15 }
  0x2a   :  { %194 = vmatpush.msra.mxu2 %v49_v28  ;;  %214 = vmatpush.msra.mxu3 %v50_v29 }
  0x2c   :  { %195 = vmatpush.msra.mxu2 %v47_v30  ;;  %215 = vmatpush.msra.mxu3 %v48_v31 }
  0x2d   :  { %87 = vmatpush.xpose.msra.mxu0 %v61_v16  ;;  %107 = vmatpush.xpose.msra.mxu1 %v62_v17 }
  0x31   :  { %88 = vmatpush.xpose.msra.mxu0 %v59_v18  ;;  %108 = vmatpush.xpose.msra.mxu1 %v60_v19 }
  0x35   :  { %89 = vmatpush.xpose.msra.mxu0 %v57_v20  ;;  %109 = vmatpush.xpose.msra.mxu1 %v58_v21 }
  0x39   :  { %90 = vmatpush.xpose.msra.mxu0 %v55_v22  ;;  %110 = vmatpush.xpose.msra.mxu1 %v56_v23 }
  0x3d   :  { %91 = vmatpush.xpose.msra.mxu0 %v53_v24  ;;  %111 = vmatpush.xpose.msra.mxu1 %v54_v25 }
  0x41   :  { %92 = vmatpush.xpose.msra.mxu0 %v51_v26  ;;  %112 = vmatpush.xpose.msra.mxu1 %v52_v27 }
  0x45   :  { %93 = vmatpush.xpose.msra.mxu0 %v49_v28  ;;  %113 = vmatpush.xpose.msra.mxu1 %v50_v29 }
  0x49   :  { %94 = vmatpush.xpose.msra.mxu0 %v47_v30  ;;  %114 = vmatpush.xpose.msra.mxu1 %v48_v31 }
  0x4c   :  { %95 = vmatmul.f32.vlgmr.msra.gmra.mxu0 %v45_v32  ;;  %115 = vmatmul.f32.vlgmr.msra.gmra.mxu1 %v46_v33 }
  0xc9   :  { %v96_v34 = vpop.f32.mrf.mxu0  ;;  %v116_v35 = vpop.f32.mrf.mxu1 }
  0xca   :  { %v117_v36 = vadd.f32 %v116_v35, %v96_v34 }
  0xcc   :  { %119 = vmax.xlane.f32.xlu0 %v117_v36 }
 0x13f   :  { %v120_v37 = vpop.xlane.xlu0 %119 }
 0x140   :  { %v121_v38 = vsub.f32 %v117_v36, %v120_v37 }
 0x142   :  { %v122_v39 = vmul.f32 1.442695, %v121_v38 }
 0x144   :  { %264 = vpow2.f32 %v122_v39 }
 0x14a   :  { %v265_v40 = vpop.eup %264 }
 0x14b   :  { %124 = vadd.xlane.f32.xlu0 %v265_v40 }
 0x1be   :  { %v125_v41 = vpop.xlane.xlu0 %124 }
 0x1bf   :  { %266 = vrcp.f32 %v125_v41  ;;  %v137_v45 = vand.u32 2147483648, %v125_v41  ;;  %v135_v47 = vand.u32 2147483647, %v125_v41  ;;  %vm131_vm1 = vweird.f32 %v125_v41 }
 0x1c1   :  { %v138_v49 = vor.u32 1.1754944e-38, %v137_v45  ;;  %vm136_vm3 = vcmp.eq.f32.partialorder %v135_v47, 8.507059e+37 }
 0x1c5   :  { %v267_v42 = vpop.eup %266 }
 0x1c6   :  { %v127_v43 = vmul.f32 %v267_v42, %v125_v41  ;;  %vm132_vm0 = vweird.f32 %v267_v42 }
 0x1c7   :  { %vm133_vm2 = vmor %vm131_vm1, %vm132_vm0 }
 0x1c8   :  { %v128_v44 = vsub.f32 1.0, %v127_v43 }
 0x1ca   :  { %v129_v46 = vmul.f32 %v267_v42, %v128_v44 }
 0x1cc   :  { %v130_v48 = vadd.f32 %v267_v42, %v129_v46 }
 0x1ce   :  { %v134_v50 = vsel %vm133_vm2, %v267_v42, %v130_v48 }
 0x1cf   :  { %v139_v51 = vsel %vm136_vm3, %v138_v49, %v134_v50 }
 0x1d0   :  { %v140_v52 = vmul.f32 %v265_v40, %v139_v51 }
 0x1d2   :  { %v257_v53 = vadd.f32 -0.0025, %v140_v52 }
 0x1d4   :  { %v144_v54 = vand.u32 2147483647, %v257_v53  ;;  %v142_v60 = vmax.f32 %v257_v53, 0.0 }
 0x1d6   :  { %v145_v55 = vadd.f32 1e-12, %v144_v54  ;;  %v143_v1 = vmul.f32 %v142_v60, %v140_v52 }
 0x1d8   :  { %268 = vrcp.f32 %v145_v55  ;;  %v157_v59 = vand.u32 2147483648, %v145_v55  ;;  %v155_v62 = vand.u32 2147483647, %v145_v55  ;;  %vm151_vm5 = vweird.f32 %v145_v55 }
 0x1da   :  { %v158_v0 = vor.u32 1.1754944e-38, %v157_v59  ;;  %vm156_vm7 = vcmp.eq.f32.partialorder %v155_v62, 8.507059e+37 }
 0x1de   :  { %v269_v56 = vpop.eup %268 }
 0x1df   :  { %v147_v57 = vmul.f32 %v269_v56, %v145_v55  ;;  %vm152_vm4 = vweird.f32 %v269_v56 }
 0x1e0   :  { %vm153_vm6 = vmor %vm151_vm5, %vm152_vm4 }
 0x1e1   :  { %v148_v58 = vsub.f32 1.0, %v147_v57 }
 0x1e3   :  { %v149_v61 = vmul.f32 %v269_v56, %v148_v58 }
 0x1e5   :  { %v150_v63 = vadd.f32 %v269_v56, %v149_v61 }
 0x1e7   :  { %v154_v2 = vsel %vm153_vm6, %v269_v56, %v150_v63 }
 0x1e8   :  { %v159_v3 = vsel %vm156_vm7, %v158_v0, %v154_v2 }
 0x1e9   :  { %v160_v4 = vmul.f32 %v159_v3, %v143_v1 }
 0x1eb   :  { %v161_v5 = vand.u32 2147483647, %v160_v4 }
 0x1ed   :  { %162 = vadd.xlane.f32.xlu1 %v161_v5 }
 0x260   :  { %v163_v6 = vpop.xlane.xlu1 %162 }
 0x261   :  { %v164_v7 = vmax.f32 %v163_v6, 1e-12 }
 0x263   :  { %270 = vrcp.f32 %v164_v7  ;;  %v176_v11 = vand.u32 2147483648, %v164_v7  ;;  %v174_v13 = vand.u32 2147483647, %v164_v7  ;;  %vm170_vm9 = vweird.f32 %v164_v7 }
 0x265   :  { %v177_v15 = vor.u32 1.1754944e-38, %v176_v11  ;;  %vm175_vm11 = vcmp.eq.f32.partialorder %v174_v13, 8.507059e+37 }
 0x269   :  { %v271_v8 = vpop.eup %270 }
 0x26a   :  { %v166_v9 = vmul.f32 %v271_v8, %v164_v7  ;;  %vm171_vm8 = vweird.f32 %v271_v8 }
 0x26b   :  { %vm172_vm10 = vmor %vm170_vm9, %vm171_vm8 }
 0x26c   :  { %v167_v10 = vsub.f32 1.0, %v166_v9 }
 0x26e   :  { %v168_v12 = vmul.f32 %v271_v8, %v167_v10 }
 0x270   :  { %v169_v14 = vadd.f32 %v271_v8, %v168_v12 }
 0x272   :  { %v173_v16 = vsel %vm172_vm10, %v271_v8, %v169_v14 }
 0x273   :  { %v178_v17 = vsel %vm175_vm11, %v177_v15, %v173_v16 }
 0x274   :  { %v179_v18 = vmul.f32 %v178_v17, %v160_v4 }
 0x276   :  { %196 = vmatmul.f32.vlgmr.msra.gmra.mxu2 %v179_v18  ;;  %222 = vst [vmem:[#allocation8] sm:$0xff] %v179_v18  ;;  %216 = vmatmul.f32.vlgmr.msra.gmra.mxu3 %v179_v18 }
 0x277   :  { %244 = dma.vmem_to_hbm [thread:$0]  %s240_s1, 128, %s242_s26, [#allocation9]  }
 0x2f9   :  { %v197_v19 = vpop.f32.mrf.mxu2  ;;  %v217_v20 = vpop.f32.mrf.mxu3 }
 0x2fa   :  { %220 = vst [vmem:[#allocation7] sm:$0xff] %v197_v19 }
 0x2fb   :  { %221 = vst [vmem:[#allocation7 + $0x8] sm:$0xff] %v217_v20 }
 0x2fc   :  { %233 = dma.vmem_to_hbm [thread:$0]  %s229_s28, 256, %s231_s4, [#allocation4]  }
 0x2fd   :  { %372 = dma.done.wait [#allocation4], 256  }
 0x2fe   :  { %373 = vsyncadd [#allocation4], 4294967040 }
 0x2ff   :  { %374 = dma.done.wait [#allocation9], 128  }
 0x300   :  { %375 = vsyncadd [#allocation9], 4294967168 }
 0x301   :  { %253 = vsyncpa [#allocation3], 1 }
 0x302   :  { %254 = vsyncpa [#allocation6], 1 }
 0x303   :  { %255 = vsyncpa [#allocation4], 1 }
 0x304   :  { %256 = vsyncpa [#allocation9], 1 }

</bundles_post_ra>
